<compile_context>
chip_gen: v7x
topology: tpu7x:2x2x1
jax: 0.10.0
libtpu: 0.0.40
codegen_flags: <defaults>
</compile_context>

<pallas_src>
import functools

import jax
import jax.numpy as jnp
from jax import lax
from jax.experimental import pallas as pl
from jax.experimental.pallas import tpu as pltpu


# ----------------------------------------------------------------------------
# helpers
# ----------------------------------------------------------------------------
def _round_up(n, m):
    return ((n + m - 1) // m) * m


# ----------------------------------------------------------------------------
# Pallas kernel: one grid step == one SAGEConv layer
# ----------------------------------------------------------------------------
def _sage_layer_kernel(n_tgt_ref, x_ref, a_ref, invdeg_ref, wcat_ref, b_ref,
                       o_ref, h_ref, *, n_classes, p_out):
    """Refs:
      n_tgt_ref : SMEM int32 [L]       valid target-row count per layer
      x_ref     : VMEM bf16 [P, C]     padded layer-0 features (resident)
      a_ref     : VMEM bf16 [1, P, P]  this layer's edge counts a[t, s]
      invdeg_ref: VMEM f32  [1, P, 1]  precomputed 1 / max(deg, 1)
      wcat_ref  : VMEM bf16 [1, 2C, C] concat([W_l; W_r]) (Cin x Cout layout)
      b_ref     : VMEM f32  [1, 1, C]  bias (W_l path only, as in PyG SAGEConv)
      o_ref     : VMEM f32  [p_out, C] log_softmax output (last step only)
      h_ref     : VMEM bf16 [P, C]     carried activations (scratch)
    """
    l = pl.program_id(0)
    last = pl.num_programs(0) - 1

    @pl.when(l == 0)
    def _():
        h_ref[...] = x_ref[...]

    h = h_ref[...]                                          # bf16 [P, C]

    # mean aggregation: (A @ h) row-scaled by precomputed 1/deg (MXU + VPU)
    aggr = jnp.dot(a_ref[0], h, preferred_element_type=jnp.float32)
    aggr = aggr * invdeg_ref[0]                             # f32 [P, C]

    # single K=2C projection matmul: [aggr | h] @ [W_l; W_r] + b
    cat = jnp.concatenate([aggr.astype(jnp.bfloat16), h], axis=-1)
    out = jnp.dot(cat, wcat_ref[0], preferred_element_type=jnp.float32)
    out = out + b_ref[0]

    @pl.when(l != last)
    def _():
        # ReLU (dropout p=0.5 is identity in eval mode); zero padded / stale
        # rows so finite-garbage can never leak into the next layer's A @ h.
        row = lax.broadcasted_iota(jnp.int32, out.shape, 0)
        h_new = jnp.where(row < n_tgt_ref[l], jnp.maximum(out, 0.0), 0.0)
        h_ref[...] = h_new.astype(jnp.bfloat16)

    @pl.when(l == last)
    def _():
        # numerically-stable log_softmax over the real class columns only,
        # restricted to the real output rows (o_ref is just p_out rows tall).
        logits = out[:p_out]
        col = lax.broadcasted_iota(jnp.int32, logits.shape, 1)
        logits = jnp.where(col < n_classes, logits, jnp.float32(-1e30))
        m = jnp.max(logits, axis=-1, keepdims=True)
        s = logits - m
        lse = jnp.log(jnp.sum(jnp.exp(s), axis=-1, keepdims=True))
        o_ref[...] = (s - lse).astype(o_ref.dtype)


# ----------------------------------------------------------------------------
# Wrapper: pad & stack per-layer operands, one pallas_call, slice real rows out
# ----------------------------------------------------------------------------
def sage_forward(params, x, adjs):
    """params: list of (w_l [Cin,Cout], w_r [Cin,Cout], b_l [1,Cout]).
       x: [N0, in_channels] f32.
       adjs: list of (edge_index [2,E] int32, size=(n_src, n_tgt))."""
    num_layers = len(params)
    assert len(adjs) == num_layers

    node_counts = [x.shape[0]] + [size[1] for (_, size) in adjs]
    chan_counts = [x.shape[1]] + [w_l.shape[1] for (w_l, _, _) in params]
    P = _round_up(max(node_counts), 128)   # common padded node count
    C = _round_up(max(chan_counts), 128)   # common padded channel count
    n_out_rows = adjs[-1][1][1]
    n_classes = params[-1][0].shape[1]
    p_out = _round_up(n_out_rows, 8)       # real output rows, f32 sublane pad

    # padded bf16 node features (layer-0 sources; x_target is a row prefix)
    x_p = (jnp.zeros((P, C), jnp.float32)
           .at[:x.shape[0], :x.shape[1]].set(x).astype(jnp.bfloat16))

    # stacked per-layer operands so the layer grid axis can stream them
    a_layers, invdeg_layers, wcat_layers, b_layers, n_tgts = [], [], [], [], []
    for (edge_index, (n_src, n_tgt)), (w_l, w_r, b_l) in zip(adjs, params):
        src, dst = edge_index[0], edge_index[1]
        # TODO(synk): at production scale replace this dense PxP adjacency (and
        # the O(P^2) host scatter) with a CSR / segment-sum aggregation path.
        counts = jnp.zeros((P, P), jnp.float32).at[dst, src].add(1.0)
        deg = jnp.zeros((P,), jnp.float32).at[dst].add(1.0)
        a_layers.append(counts.astype(jnp.bfloat16))
        invdeg_layers.append((1.0 / jnp.maximum(deg, 1.0)).reshape(P, 1))
        cin, cout = w_l.shape
        wcat = jnp.zeros((2 * C, C), jnp.float32)
        wcat = wcat.at[:cin, :cout].set(w_l)
        wcat = wcat.at[C:C + cin, :cout].set(w_r)
        wcat_layers.append(wcat.astype(jnp.bfloat16))
        b_layers.append(jnp.zeros((1, C), jnp.float32).at[:, :cout].set(b_l))
        n_tgts.append(n_tgt)

    a_stack = jnp.stack(a_layers)             # [L, P, P]   bf16
    invdeg_stack = jnp.stack(invdeg_layers)   # [L, P, 1]   f32
    wcat_stack = jnp.stack(wcat_layers)       # [L, 2C, C]  bf16
    b_stack = jnp.stack(b_layers)             # [L, 1, C]   f32
    n_tgt_arr = jnp.asarray(n_tgts, jnp.int32)

    kernel = functools.partial(_sage_layer_kernel,
                               n_classes=n_classes, p_out=p_out)

    grid_spec = pltpu.PrefetchScalarGridSpec(
        num_scalar_prefetch=1,
        grid=(num_layers,),
        in_specs=[
            pl.BlockSpec((P, C), lambda l, nt: (0, 0)),            # x (resident)
            pl.BlockSpec((1, P, P), lambda l, nt: (l, 0, 0)),      # A_l
            pl.BlockSpec((1, P, 1), lambda l, nt: (l, 0, 0)),      # 1/deg_l
            pl.BlockSpec((1, 2 * C, C), lambda l, nt: (l, 0, 0)),  # [W_l; W_r]
            pl.BlockSpec((1, 1, C), lambda l, nt: (l, 0, 0)),      # b_l
        ],
        out_specs=pl.BlockSpec((p_out, C), lambda l, nt: (0, 0)),
        scratch_shapes=[pltpu.VMEM((P, C), jnp.bfloat16)],
    )

    flops = num_layers * (2 * P * P * C + 2 * P * (2 * C) * C)
    transcendentals = p_out * C + p_out
    in_arrays = (x_p, a_stack, invdeg_stack, wcat_stack, b_stack)
    bytes_accessed = sum(int(op.size) * op.dtype.itemsize for op in in_arrays)
    bytes_accessed += p_out * C * 4

    # explicit VMEM budget: 2x (double buffered per-layer operands) + residents
    per_layer_bytes = (P * P * 2) + (P * 4) + (2 * C * C * 2) + (C * 4)
    resident_bytes = 2 * (P * C * 2) + p_out * C * 4
    vmem_limit = int(min(64 * 1024 * 1024,
                         max(16 * 1024 * 1024,
                             2 * (2 * per_layer_bytes + resident_bytes))))

    out_p = pl.pallas_call(
        kernel,
        out_shape=jax.ShapeDtypeStruct((p_out, C), jnp.float32),
        grid_spec=grid_spec,
        compiler_params=pltpu.CompilerParams(
            dimension_semantics=("arbitrary",),
            vmem_limit_bytes=vmem_limit),
        cost_estimate=pl.CostEstimate(flops=flops,
                                      transcendentals=transcendentals,
                                      bytes_accessed=bytes_accessed),
    )(n_tgt_arr, x_p, a_stack, invdeg_stack, wcat_stack, b_stack)

    return out_p[:n_out_rows, :n_classes]


# ----------------------------------------------------------------------------
# Parameter init + pure-JAX reference (for validation)
# ----------------------------------------------------------------------------
def init_sage_params(key, in_channels, hidden_channels, out_channels,
                     num_layers):
    dims_in = [in_channels] + [hidden_channels] * (num_layers - 1)
    dims_out = [hidden_channels] * (num_layers - 1) + [out_channels]
    params = []
    for cin, cout in zip(dims_in, dims_out):
        k1, k2, key = jax.random.split(key, 3)
        scale = (6.0 / (cin + cout)) ** 0.5  # glorot-uniform-ish
        w_l = jax.random.uniform(k1, (cin, cout), jnp.float32, -scale, scale)
        w_r = jax.random.uniform(k2, (cin, cout), jnp.float32, -scale, scale)
        b_l = jnp.zeros((1, cout), jnp.float32)
        params.append((w_l, w_r, b_l))
    return params


def sage_reference(params, x, adjs):
    """Exact f32 reference of the same forward pass (plain JAX)."""
    h = x
    num_layers = len(params)
    for i, (edge_index, (n_src, n_tgt)) in enumerate(adjs):
        src, dst = edge_index[0], edge_index[1]
        x_src, x_tgt = h[:n_src], h[:n_tgt]
        c = x_src.shape[1]
        aggr = jnp.zeros((n_tgt, c), jnp.float32).at[dst].add(x_src[src])
        deg = jnp.zeros((n_tgt,), jnp.float32).at[dst].add(1.0)
        aggr = aggr / jnp.maximum(deg, 1.0)[:, None]
        w_l, w_r, b_l = params[i]
        h = aggr @ w_l + b_l + x_tgt @ w_r
        if i != num_layers - 1:
            h = jnp.maximum(h, 0.0)
    return jax.nn.log_softmax(h, axis=-1)


# ----------------------------------------------------------------------------
if __name__ == "__main__":
    key = jax.random.PRNGKey(0)

    in_channels, hidden_channels, out_channels, num_layers = 32, 32, 16, 2
    # Sampled-subgraph node counts per hop: N0 (all) -> N1 -> N2 (batch)
    N0, N1, N2 = 64, 32, 16

    k_x, k_e1s, k_e1d, k_e2s, k_e2d, k_p = jax.random.split(key, 6)
    x = jax.random.normal(k_x, (N0, in_channels), jnp.float32)

    E1 = 128  # layer 0: sources in [0, N0) -> targets in [0, N1)
    e1 = jnp.stack([
        jax.random.randint(k_e1s, (E1,), 0, N0, jnp.int32),
        jax.random.randint(k_e1d, (E1,), 0, N1, jnp.int32),
    ])
    E2 = 64   # layer 1: sources in [0, N1) -> targets in [0, N2)
    e2 = jnp.stack([
        jax.random.randint(k_e2s, (E2,), 0, N1, jnp.int32),
        jax.random.randint(k_e2d, (E2,), 0, N2, jnp.int32),
    ])
    adjs = [(e1, (N0, N1)), (e2, (N1, N2))]

    params = init_sage_params(k_p, in_channels, hidden_channels,
                              out_channels, num_layers)

    out = sage_forward(params, x, adjs)
    out = jax.block_until_ready(out)
    assert out.shape == (N2, out_channels)

    # validate against exact f32 reference (kernel uses bf16 operands, so allow
    # a loose tolerance on the log-probs)
    ref = jax.block_until_ready(sage_reference(params, x, adjs))
    max_err = float(jnp.max(jnp.abs(out - ref)))
    assert jnp.all(jnp.isfinite(out)), "non-finite kernel output"
    assert max_err < 0.35, f"kernel vs reference mismatch: max_err={max_err}"

    print("KERNEL_OK")
</pallas_src>

<mosaic_0001>
module attributes {stable_mosaic.version = 11 : i64} {
  func.func @_sage_layer_kernel(%arg0: i32, %arg1: memref<2xi32, #tpu.memory_space<smem>>, %arg2: memref<128x128xbf16, #tpu.memory_space<vmem>>, %arg3: memref<1x128x128xbf16, #tpu.memory_space<vmem>>, %arg4: memref<1x128x1xf32, #tpu.memory_space<vmem>>, %arg5: memref<1x256x128xbf16, #tpu.memory_space<vmem>>, %arg6: memref<1x1x128xf32, #tpu.memory_space<vmem>>, %arg7: memref<16x128xf32, #tpu.memory_space<vmem>>, %arg8: memref<128x128xbf16, #tpu.memory_space<vmem>>) attributes {dimension_semantics = [#tpu.dimension_semantics<arbitrary>], iteration_bounds = array<i64: 2>, scalar_prefetch = 1 : i64, scratch_operands = 1 : i64, tpu.core_type = #tpu.core_type<tc>, window_params = [{pipeline_mode = #tpu.pipeline_mode<synchronous>, transform_indices = @transform_0, window_bounds = array<i64: 128, 128>}, {transform_indices = @transform_1, window_bounds = array<i64: 1, 128, 128>}, {transform_indices = @transform_2, window_bounds = array<i64: 1, 128, 1>}, {transform_indices = @transform_3, window_bounds = array<i64: 1, 256, 128>}, {transform_indices = @transform_4, window_bounds = array<i64: 1, 1, 128>}, {pipeline_mode = #tpu.pipeline_mode<synchronous>, transform_indices = @transform_5, window_bounds = array<i64: 16, 128>}]} {
    %c0_i32 = arith.constant 0 : i32
    %0 = arith.cmpi eq, %arg0, %c0_i32 : i32
    %1 = arith.extui %0 : i1 to i32
    %c0_i32_0 = arith.constant 0 : i32
    %2 = arith.cmpi ne, %1, %c0_i32_0 : i32
    scf.if %2 {
      %c0_18 = arith.constant 0 : index
      %c0_19 = arith.constant 0 : index
      %26 = vector.load %arg2[%c0_18, %c0_19] : memref<128x128xbf16, #tpu.memory_space<vmem>>, vector<128x128xbf16>
      %c0_20 = arith.constant 0 : index
      %c0_21 = arith.constant 0 : index
      %27 = vector.load %arg8[%c0_20, %c0_21] : memref<128x128xbf16, #tpu.memory_space<vmem>>, vector<128x128xbf16>
      tpu.vector_store %arg8[%c0_20, %c0_21], %26 {strides = array<i32>} : memref<128x128xbf16, #tpu.memory_space<vmem>>, vector<128x128xbf16>,
    } else {
    }
    %c0 = arith.constant 0 : index
    %c0_1 = arith.constant 0 : index
    %3 = vector.load %arg8[%c0, %c0_1] : memref<128x128xbf16, #tpu.memory_space<vmem>>, vector<128x128xbf16>
    %c0_2 = arith.constant 0 : index
    %c0_3 = arith.constant 0 : index
    %c0_4 = arith.constant 0 : index
    %4 = vector.load %arg3[%c0_2, %c0_3, %c0_4] : memref<1x128x128xbf16, #tpu.memory_space<vmem>>, vector<1x128x128xbf16>
    %5 = vector.shape_cast %4 : vector<1x128x128xbf16> to vector<128x128xbf16>
    %cst = arith.constant dense<0.000000e+00> : vector<128x128xf32>
    %6 = tpu.matmul %5, %3, %cst {dimension_numbers = #tpu.dot_dimension_numbers<[1], [0], [0], [1], [0, 0, 1, 1], [], []>} : vector<128x128xbf16>, vector<128x128xbf16>, vector<128x128xf32> -> vector<128x128xf32>
    %c0_5 = arith.constant 0 : index
    %c0_6 = arith.constant 0 : index
    %c0_7 = arith.constant 0 : index
    %7 = vector.load %arg4[%c0_5, %c0_6, %c0_7] : memref<1x128x1xf32, #tpu.memory_space<vmem>>, vector<1x128x1xf32>
    %8 = vector.shape_cast %7 : vector<1x128x1xf32> to vector<128x1xf32>
    %9 = vector.broadcast %8 : vector<128x1xf32> to vector<128x128xf32>
    %10 = arith.mulf %6, %9 : vector<128x128xf32>
    %11 = arith.truncf %10 : vector<128x128xf32> to vector<128x128xbf16>
    %12 = tpu.concatenate %11, %3 in 1 : vector<128x128xbf16>, vector<128x128xbf16> -> vector<128x256xbf16>
    %c0_8 = arith.constant 0 : index
    %c0_9 = arith.constant 0 : index
    %c0_10 = arith.constant 0 : index
    %13 = vector.load %arg5[%c0_8, %c0_9, %c0_10] : memref<1x256x128xbf16, #tpu.memory_space<vmem>>, vector<1x256x128xbf16>
    %14 = vector.shape_cast %13 : vector<1x256x128xbf16> to vector<256x128xbf16>
    %cst_11 = arith.constant dense<0.000000e+00> : vector<128x128xf32>
    %15 = tpu.matmul %12, %14, %cst_11 {dimension_numbers = #tpu.dot_dimension_numbers<[1], [0], [0], [1], [0, 0, 1, 1], [], []>} : vector<128x256xbf16>, vector<256x128xbf16>, vector<128x128xf32> -> vector<128x128xf32>
    %c0_12 = arith.constant 0 : index
    %c0_13 = arith.constant 0 : index
    %c0_14 = arith.constant 0 : index
    %16 = vector.load %arg6[%c0_12, %c0_13, %c0_14] : memref<1x1x128xf32, #tpu.memory_space<vmem>>, vector<1x1x128xf32>
    %17 = vector.shape_cast %16 : vector<1x1x128xf32> to vector<1x128xf32>
    %18 = vector.broadcast %17 : vector<1x128xf32> to vector<128x128xf32>
    %19 = arith.addf %15, %18 : vector<128x128xf32>
    %c1_i32 = arith.constant 1 : i32
    %20 = arith.cmpi ne, %arg0, %c1_i32 : i32
    %21 = arith.extui %20 : i1 to i32
    %c0_i32_15 = arith.constant 0 : i32
    %22 = arith.cmpi ne, %21, %c0_i32_15 : i32
    scf.if %22 {
      %26 = tpu.iota {dimensions = array<i32: 0>} : vector<128x128xi32>
      %27 = arith.index_cast %arg0 : i32 to index
      %28 = memref.load %arg1[%27] : memref<2xi32, #tpu.memory_space<smem>>
      %29 = vector.broadcast %28 : i32 to vector<128x128xi32>
      %30 = arith.cmpi slt, %26, %29 : vector<128x128xi32>
      %cst_18 = arith.constant 0.000000e+00 : f32
      %31 = vector.broadcast %cst_18 : f32 to vector<128x128xf32>
      %32 = arith.maximumf %19, %31 : vector<128x128xf32>
      %cst_19 = arith.constant 0.000000e+00 : f32
      %33 = vector.broadcast %cst_19 : f32 to vector<128x128xf32>
      %34 = arith.select %30, %32, %33 : vector<128x128xi1>, vector<128x128xf32>
      %35 = arith.truncf %34 : vector<128x128xf32> to vector<128x128xbf16>
      %c0_20 = arith.constant 0 : index
      %c0_21 = arith.constant 0 : index
      %36 = vector.load %arg8[%c0_20, %c0_21] : memref<128x128xbf16, #tpu.memory_space<vmem>>, vector<128x128xbf16>
      tpu.vector_store %arg8[%c0_20, %c0_21], %35 {strides = array<i32>} : memref<128x128xbf16, #tpu.memory_space<vmem>>, vector<128x128xbf16>,
    } else {
    }
    %c1_i32_16 = arith.constant 1 : i32
    %23 = arith.cmpi eq, %arg0, %c1_i32_16 : i32
    %24 = arith.extui %23 : i1 to i32
    %c0_i32_17 = arith.constant 0 : i32
    %25 = arith.cmpi ne, %24, %c0_i32_17 : i32
    scf.if %25 {
      %26 = vector.extract_strided_slice %19 {offsets = [0, 0], sizes = [16, 128], strides = [1, 1]} : vector<128x128xf32> to vector<16x128xf32>
      %27 = tpu.iota {dimensions = array<i32: 1>} : vector<16x128xi32>
      %c16_i32 = arith.constant 16 : i32
      %28 = vector.broadcast %c16_i32 : i32 to vector<16x128xi32>
      %29 = arith.cmpi slt, %27, %28 : vector<16x128xi32>
      %cst_18 = arith.constant -1.000000e+30 : f32
      %30 = vector.broadcast %cst_18 : f32 to vector<16x128xf32>
      %31 = arith.select %29, %26, %30 : vector<16x128xi1>, vector<16x128xf32>
      %cst_19 = arith.constant dense<0xFF800000> : vector<16xf32>
      %32 = vector.multi_reduction <maximumf>, %31, %cst_19 [1] : vector<16x128xf32> to vector<16xf32>
      %33 = vector.shape_cast %32 : vector<16xf32> to vector<16x1xf32>
      %34 = vector.broadcast %33 : vector<16x1xf32> to vector<16x128xf32>
      %35 = arith.subf %31, %34 : vector<16x128xf32>
      %36 = math.exp %35 : vector<16x128xf32>
      %cst_20 = arith.constant dense<0.000000e+00> : vector<16xf32>
      %37 = vector.multi_reduction <add>, %36, %cst_20 [1] : vector<16x128xf32> to vector<16xf32>
      %38 = vector.shape_cast %37 : vector<16xf32> to vector<16x1xf32>
      %39 = math.log %38 : vector<16x1xf32>
      %40 = vector.broadcast %39 : vector<16x1xf32> to vector<16x128xf32>
      %41 = arith.subf %35, %40 : vector<16x128xf32>
      %c0_21 = arith.constant 0 : index
      %c0_22 = arith.constant 0 : index
      %42 = vector.load %arg7[%c0_21, %c0_22] : memref<16x128xf32, #tpu.memory_space<vmem>>, vector<16x128xf32>
      tpu.vector_store %arg7[%c0_21, %c0_22], %41 {strides = array<i32>} : memref<16x128xf32, #tpu.memory_space<vmem>>, vector<16x128xf32>,
    } else {
    }
    return
  }
  func.func @transform_0(%arg0: i32, %arg1: memref<2xi32, #tpu.memory_space<smem>>) -> (i32, i32) {
    %c0_i32 = arith.constant 0 : i32
    %c0_i32_0 = arith.constant 0 : i32
    %c0_i32_1 = arith.constant 0 : i32
    return %c0_i32, %c0_i32_0 : i32, i32
  }
  func.func @transform_1(%arg0: i32, %arg1: memref<2xi32, #tpu.memory_space<smem>>) -> (i32, i32, i32) {
    %c0_i32 = arith.constant 0 : i32
    %c0_i32_0 = arith.constant 0 : i32
    %c0_i32_1 = arith.constant 0 : i32
    return %arg0, %c0_i32, %c0_i32_0 : i32, i32, i32
  }
  func.func @transform_2(%arg0: i32, %arg1: memref<2xi32, #tpu.memory_space<smem>>) -> (i32, i32, i32) {
    %c0_i32 = arith.constant 0 : i32
    %c0_i32_0 = arith.constant 0 : i32
    %c0_i32_1 = arith.constant 0 : i32
    return %arg0, %c0_i32, %c0_i32_0 : i32, i32, i32
  }
  func.func @transform_3(%arg0: i32, %arg1: memref<2xi32, #tpu.memory_space<smem>>) -> (i32, i32, i32) {
    %c0_i32 = arith.constant 0 : i32
    %c0_i32_0 = arith.constant 0 : i32
    %c0_i32_1 = arith.constant 0 : i32
    return %arg0, %c0_i32, %c0_i32_0 : i32, i32, i32
  }
  func.func @transform_4(%arg0: i32, %arg1: memref<2xi32, #tpu.memory_space<smem>>) -> (i32, i32, i32) {
    %c0_i32 = arith.constant 0 : i32
    %c0_i32_0 = arith.constant 0 : i32
    %c0_i32_1 = arith.constant 0 : i32
    return %arg0, %c0_i32, %c0_i32_0 : i32, i32, i32
  }
  func.func @transform_5(%arg0: i32, %arg1: memref<2xi32, #tpu.memory_space<smem>>) -> (i32, i32) {
    %c0_i32 = arith.constant 0 : i32
    %c0_i32_0 = arith.constant 0 : i32
    %c0_i32_1 = arith.constant 0 : i32
    return %c0_i32, %c0_i32_0 : i32, i32
  }
}

</mosaic_0001>

<bundles_post_ra>
// kernel: tpu_custom_call.1
= control target key start
LH: loop header
LB: loop body
LE: loop exit
PB: predicated region body
PF: predicated region fallthrough
CT: control target
= control target key end

     0   :  { %s1948_s0 = inlined_call_operand.vmem [shape: s32[2], index: 0, kind: input, shape index: {}]   ;;  %s1949_s1 = inlined_call_operand.hbm [shape: bf16[128,128], index: 1, kind: input, shape index: {}]   ;;  %s1950_s2 = inlined_call_operand.hbm [shape: bf16[2,128,128], index: 2, kind: input, shape index: {}]   ;;  %s1951_s3 = inlined_call_operand.vmem [shape: f32[2,128,1], index: 3, kind: input, shape index: {}]   ;;  %s1952_s4 = inlined_call_operand.vmem [shape: bf16[2,256,128], index: 4, kind: input, shape index: {}]   ;;  %s1953_s5 = inlined_call_operand.vmem [shape: f32[2,1,128], index: 5, kind: input, shape index: {}]   ;;  %s1954_s6 = inlined_call_operand.hbm [shape: f32[16,128], index: 6, kind: output, shape index: {}]  }
   0x1   :  { %s11_s23 = sshll.u32 %s1948_s0, 4  ;;  %s12_s23 = int_to_ptr.vmem [resolvable:$true] %s11_s23 }
   0x2   :  { %s1417_s24 = scalar_lea.vmem %s12_s23, 16  ;;  %p1422_p1 = scmp.lt.s32.totalorder %s12_s23, %s12_s23 }
   0x3   :  { %p1418_p0 = scmp.ne.s32.totalorder %s12_s23, %s1417_s24  ;;  %p1423_p2 = scmp.lt.s32.totalorder %s1417_s24, %s1417_s24 }
   0x5   :  { %p1424_p3 = por %p1423_p2, %p1422_p1 }
   0x7   :  { %p1425_p4 = pnand %p1424_p3, %p1418_p0 }
   0x9   :  { %1428 = shalt.err (!%p1425_p4)  }
   0xa   :  { %s1559_s25 = smov [#allocation4]  }
   0xb   :  { %14 = dma.vmem_to_smem %s12_s23, 16, %s1559_s25, [#allocation3] }
   0xc   :  { %1529 = dma.done.wait [#allocation3], 16 }
   0xd   :  { %1530 = vsyncadd [#allocation3], 4294967280 }
   0xe   :  { %16 = sfence }
   0xf   :  { %17 = vsyncpa [#allocation6], 0 }
  0x10   :  { %18 = vsyncpa [#allocation9], 0 }
  0x11   :  { %20 = vsyncpa [#allocation9 + $0x1], 0 }
  0x12   :  { %21 = vsyncpa [#allocation7], 0  ;;  %s1606_s26 = smov 0   ;;  %s1608_s0 = smov 0  }
  0x13   :  { %s1610_s27 = smov 0   ;;  %s1612_s28 = smov 0  }
  0x14 LB: > { %s1625_s29 = sadd.s32 4294967295, %s1557_s28   ;;  %p68_p5 = scmp.ne.s32.totalorder %s1549_s0, %s1545_s26  ;;  %s1557_s28 = sphi %s1612_s28, %s1971_s28   ;;  %s1553_s27 = sphi %s1610_s27, %s1970_s27   ;;  %s1549_s0 = sphi %s1608_s0, %s1969_s0   ;;  %s1545_s26 = sphi %s1606_s26, %s1968_s26  }
  0x15   : > { %p1955_p6 = scmp.eq.s32.totalorder %s1625_s29, 0  ;;  %p1128_p7 = scmp.ge.s32.totalorder %s1557_s28, 1 }
  0x16   : > { %p178_p8 = scmp.lt.s32.totalorder %s1557_s28, 3  ;;  %s1560_s8 = smov [#allocation5]  }
  0x17   : > { %p1634_p10 = por %p1955_p6, %p68_p5  ;;  %s190_s9 = sshll.u32 %s1560_s8, 4  ;;  %s191_s9 = int_to_ptr.vmem [resolvable:$true] %s190_s9 }
  0x18   : > { %p1638_p11 = pnand %p1128_p7, %p178_p8  ;;  %s1651_s11 = sadd.s32 1, %s1557_s28  }
  0x19   : > { %s1958_s30 = scalar_select %p1634_p10, 1, 0 }
  0x1a   : > { %s1959_s7 = scalar_select %p1638_p11, 1, 0 }
  0x1b   : > { %p1322_p12 = pneg %p1638_p11  ;;  %s55_s12 = sadd.s32 1, %s1553_s27 }
  0x1c   : > { %s52_s13 = ssub.s32 %s1557_s28, %s1651_s11  ;;  %s1429_s16 = scalar_lea.hbm %s1949_s1, 1024 }
  0x1d   : > { %p1646_p13 = pnand %p1322_p12, %p1955_p6  ;;  %p1430_p0 = scmp.ne.s32.totalorder %s1949_s1, %s1429_s16 }
  0x1e   : > { %p1436_p4 = scmp.lt.u32.totalorder %s1429_s16, %s1949_s1 }
  0x1f   : > { %p1431_p1 = pneg %p1646_p13 }
  0x21   : > { %p1432_p2 = pnand %p1431_p1, %p1430_p0 }
  0x23   : > { %p1433_p3 = pneg %p1432_p2 }
  0x25   : > { %p1438_p5 = pnand %p1436_p4, %p1433_p3 }
  0x27   : > { %1441 = shalt.err (!%p1438_p5)
}
  0x28   : > { %s1442_s21 = scalar_lea.vmem %s191_s9, 1024  ;;  %p1450_p9 = scmp.lt.s32.totalorder %s191_s9, %s191_s9 }
  0x29   : > { %p1443_p7 = scmp.ne.s32.totalorder %s191_s9, %s1442_s21  ;;  %p1451_p6 = scmp.lt.s32.totalorder %s1442_s21, %s1442_s21 }
  0x2b   : > { %p1445_p8 = pnand %p1443_p7, %p1431_p1  ;;  %p1452_p10 = por %p1451_p6, %p1450_p9 }
  0x2d   : > { %p1446_p12 = pneg %p1445_p8 }
  0x2f   : > { %p1453_p11 = pnand %p1452_p10, %p1446_p12 }
  0x31   : > { %1456 = shalt.err (!%p1453_p11)
}
  0x32   : > { %s1561_s22 = smov 64   ;;  %s1562_s23 = smov 4  }
  0x33   : > { %1325 = dma.hbm_to_vmem [thread:$0]  (!%p1646_p13), %s1949_s1, 1024, %s191_s9, [#allocation6], %s1561_s22, %s1561_s22, %s1562_s23  }
  0x34   : > { %p53_p6 = scmp.eq.s32.totalorder %s52_s13, 0  ;;  %p62_p9 = scmp.ne.s32.totalorder %s1553_s27, %s1549_s0 }
  0x35   : > { %p63_p10 = scmp.eq.s32.totalorder %s1557_s28, 0  ;;  %p1331_p11 = scmp.lt.s32.totalorder %s1557_s28, 2 }
  0x36   : > { %s1680_s26 = scalar_select %p53_p6, %s1553_s27, %s55_s12  }
  0x37   : > { %p64_p0 = por %p63_p10, %p62_p9  ;;  %s204_s8 = sand.u32 1, %s1553_s27  }
  0x38   : > { %s1131_s14 = sshll.u32 %s204_s8, 6  ;;  %s1181_s15 = sshll.u32 %s1557_s28, 10 }
  0x39   : > { %s1687_s10 = scalar_lea.hbm %s1950_s2, %s1181_s15  ;;  %s208_s9 = scalar_lea.vmem [#allocation8], %s1131_s14 }
  0x3a   : > { %s215_s13 = sshll.u32 %s208_s9, 4  ;;  %p1691_p13 = pnand %p1331_p11, %p64_p0  ;;  %s1689_s13 = int_to_ptr.vmem [resolvable:$true] %s215_s13 }
  0x3b   : > { %s1695_s28 = scalar_lea.sflag [#allocation9], %s204_s8  ;;  %s1457_s18 = scalar_lea.hbm %s1687_s10, 1024 }
  0x3c   : > { %p1458_p1 = scmp.ne.s32.totalorder %s1687_s10, %s1457_s18  ;;  %p1459_p2 = pneg %p1691_p13 }
  0x3d   : > { %s1462_s21 = scalar_lea.hbm %s1950_s2, 2048  ;;  %p1463_p5 = scmp.lt.u32.totalorder %s1687_s10, %s1950_s2 }
  0x3e   : > { %p1460_p3 = pnand %p1459_p2, %p1458_p1  ;;  %p1464_p7 = scmp.lt.u32.totalorder %s1462_s21, %s1457_s18 }
  0x3f   : > { %p1466_p12 = scmp.lt.u32.totalorder %s1457_s18, %s1687_s10 }
  0x40   : > { %p1461_p4 = pneg %p1460_p3  ;;  %p1465_p8 = por %p1464_p7, %p1463_p5 }
  0x42   : > { %p1467_p6 = por %p1466_p12, %p1465_p8 }
  0x44   : > { %p1468_p9 = pnand %p1467_p6, %p1461_p4 }
  0x46   : > { %1471 = shalt.err (!%p1468_p9)
}
  0x47   : > { %s1472_s8 = scalar_lea.vmem %s1689_s13, 1024  ;;  %s1563_s14 = smov [#allocation8]  }
  0x48   : > { %p1473_p10 = scmp.ne.s32.totalorder %s1689_s13, %s1472_s8  ;;  %s1477_s15 = sshll.u32 %s1563_s14, 4  ;;  %s1478_s15 = int_to_ptr.vmem [resolvable:$false] %s1477_s15 }
  0x49   : > { %s1479_s16 = scalar_lea.vmem %s1478_s15, 2048  ;;  %p1480_p1 = scmp.lt.s32.totalorder %s1689_s13, %s1478_s15 }
  0x4a   : > { %p1475_p11 = pnand %p1473_p10, %p1459_p2  ;;  %p1481_p3 = scmp.lt.s32.totalorder %s1479_s16, %s1472_s8 }
  0x4c   : > { %p1476_p0 = pneg %p1475_p11  ;;  %p1482_p5 = por %p1481_p3, %p1480_p1 }
  0x4e   : > { %p1483_p7 = pnand %p1482_p5, %p1476_p0 }
  0x50   : > { %1486 = shalt.err (!%p1483_p7)
}
  0x51   : > { %1329 = dma.hbm_to_vmem [thread:$0]  (!%p1691_p13), %s1687_s10, 1024, %s1689_s13, %s1695_s28, %s1561_s22, %s1561_s22, %s1562_s23  }
  0x52   : > { %p1962_p2 = scmp.ne.s32.totalorder %s1959_s7, 0 }
  0x53   : > { %p1963_p4 = scmp.eq.s32.totalorder (!%p1962_p2), %s1625_s29, 0 }
  0x54   : > { %249 = sbr.rel (%p1962_p2) target bundleno = 983 (0x3d7), region = 40 }
  0x5b   : > { %1532 = dma.done.wait (%p1963_p4), [#allocation6], 1024   ;;  %p1964_p8 = pmov %p1963_p4 }
  0x5c   : > { %s255_s17 = sand.u32 1, %s1549_s0   ;;  %p1965_p12 = scmp.ne.s32.totalorder %s1958_s30, 0 }
  0x5d   : > { %1534 = vsyncadd (%p1964_p8), [#allocation6], 4294966272  ;;  %s1136_s9 = sshll.u32 %s255_s17, 6  ;;  %s256_s12 = scalar_lea.sflag [#allocation9], %s255_s17 }
  0x5e   : > { %s1733_s18 = scalar_lea.vmem [#allocation8], %s1136_s9 }
  0x5f   : > { %1536 = dma.done.wait (%p1965_p12), %s256_s12, 1024  }
  0x60   : > { %1538 = vsyncadd (%p1965_p12), %s256_s12, 4294966272  ;;  %p294_p13 = scmp.lt.s32.totalorder %s1625_s29, 1  ;;  %p1966_p6 = scmp.ne.s32.totalorder %s1625_s29, 0 }
  0x61   : > { %v1375_v0 = vld [vmem:[#allocation5] sm:$0xff] (!%p1966_p6)   ;;  %v1376_v1 = vld [vmem:[#allocation5 + $0x8] sm:$0xff] (!%p1966_p6)   ;;  %v1377_v2 = vld [vmem:[#allocation5 + $0x10] sm:$0xff] (!%p1966_p6)  }
  0x62   : > { %s1741_s7 = scalar_select %p294_p13, %s1625_s29, 1 }
  0x63   : > { %311 = sbr.rel (%p1966_p6) target bundleno = 106 (0x6a), region = 52  ;;  %376 = vst [vmem:[#allocation2] sm:$0xff] (!%p1966_p6), %v1375_v0  ;;  %377 = vst [vmem:[#allocation2 + $0x8] sm:$0xff] (!%p1966_p6), %v1376_v1  ;;  %v1378_v3 = vld [vmem:[#allocation5 + $0x18] sm:$0xff] (!%p1966_p6)   ;;  %v1379_v4 = vld [vmem:[#allocation5 + $0x20] sm:$0xff] (!%p1966_p6)  }
  0x64   : > { %s1182_s22 = sshll.u32 %s1741_s7, 7  ;;  %s306_s13 = scalar_lea.vmem %s1953_s5, %s1741_s7  ;;  %378 = vst [vmem:[#allocation2 + $0x10] sm:$0xff] (!%p1966_p6), %v1377_v2  ;;  %379 = vst [vmem:[#allocation2 + $0x18] sm:$0xff] (!%p1966_p6), %v1378_v3  ;;  %v1380_v5 = vld [vmem:[#allocation5 + $0x28] sm:$0xff] (!%p1966_p6)   ;;  %v1381_v6 = vld [vmem:[#allocation5 + $0x30] sm:$0xff] (!%p1966_p6)  }
  0x65   : > { %s1751_s20 = scalar_lea.vmem %s1951_s3, %s1182_s22  ;;  %s1756_s24 = scalar_lea.vmem %s1952_s4, %s1182_s22  ;;  %380 = vst [vmem:[#allocation2 + $0x20] sm:$0xff] (!%p1966_p6), %v1379_v4  ;;  %381 = vst [vmem:[#allocation2 + $0x28] sm:$0xff] (!%p1966_p6), %v1380_v5  ;;  %v1382_v7 = vld [vmem:[#allocation5 + $0x38] sm:$0xff] (!%p1966_p6)  }
  0x66   : > { %382 = vst [vmem:[#allocation2 + $0x30] sm:$0xff] (!%p1966_p6), %v1381_v6  ;;  %383 = vst [vmem:[#allocation2 + $0x38] sm:$0xff] (!%p1966_p6), %v1382_v7 }
  0x6a PF: > { %v1760_v8 = vld [vmem:[#allocation2] sm:$0xff]  ;;  %v1762_v9 = vld [vmem:[#allocation2 + $0x8] sm:$0xff]  ;;  %v1564_v10 = vmov 0   ;;  %v559_v15 = vld [vmem:[%s1751_s20 + $0x30] sm:$0xff]  ;;  %p1175_p9 = scmp.eq.s32.totalorder %s1625_s29, 1 }
  0x6b   : > { %1264 = vmatprep.subr.bf16.mxu0 %v1760_v8  ;;  %1383 = vset.pattern.permute.xlu0 %v1564_v10  ;;  %v386_v11 = vld [vmem:[#allocation2 + $0x10] sm:$0xff]  ;;  %v1385_v12 = vld [vmem:[%s1733_s18] sm:$0xff]   ;;  %v1769_v13 = vld [vmem:[#allocation2 + $0x18] sm:$0xff]  ;;  %s926_s14 = sld [smem:[#allocation4 + %s1625_s29]] (!%p1175_p9) }
  0x6c   : > { %1265 = vmatpush3.bf16.msra.mxu0 %v1760_v8  ;;  %1384 = vset.pattern.permute.xlu1 %v1564_v10  ;;  %v557_v14 = vld [vmem:[%s1751_s20 + $0x20] sm:$0xff]  ;;  %v558_v17 = vld [vmem:[%s1751_s20 + $0x28] sm:$0xff]  ;;  %v560_v18 = vld [vmem:[%s1751_s20 + $0x38] sm:$0xff] }
  0x6d   : > { %1266 = vmatprep.subr.bf16.mxu0 %v1762_v9  ;;  %856 = vmatprep.mubr.bf16.mxu1 %v386_v11  ;;  %v1774_v16 = vld [vmem:[#allocation2 + $0x20] sm:$0xff]  ;;  %v1780_v19 = vld [vmem:[#allocation2 + $0x28] sm:$0xff]  ;;  %v1786_v23 = vld [vmem:[#allocation2 + $0x30] sm:$0xff] }
  0x6e   : > { %1280 = vmatprep.mubr.bf16.mxu0 %v1385_v12  ;;  %591 = vperm.xlu0 %1383, %v557_v14   ;;  %v561_v20 = vld [vmem:[%s1751_s20 + $0x40] sm:$0xff]  ;;  %v562_v22 = vld [vmem:[%s1751_s20 + $0x48] sm:$0xff]  ;;  %v563_v26 = vld [vmem:[%s1751_s20 + $0x50] sm:$0xff] }
  0x6f   : > { %601 = vperm.xlu1 %1384, %v559_v15   ;;  %v1393_v21 = vld [vmem:[%s1756_s24 + $0x40] sm:$0xff]   ;;  %v1395_v25 = vld [vmem:[%s1756_s24 + $0x48] sm:$0xff]   ;;  %v564_v27 = vld [vmem:[%s1751_s20 + $0x58] sm:$0xff] }
  0x70   : > { %1267 = vmatpush3.bf16.msra.mxu0 %v1762_v9  ;;  %v1394_v24 = vld [vmem:[%s1756_s24] sm:$0xff]   ;;  %1296 = vmatprep.subr.bf16.mxu1 %v1393_v21  ;;  %v1794_v28 = vld [vmem:[#allocation2 + $0x38] sm:$0xff]  ;;  %v1396_v30 = vld [vmem:[%s1756_s24 + $0x8] sm:$0xff]  }
  0x71   : > { %1268 = vmatprep.subr.bf16.mxu0 %v386_v11  ;;  %1304 = vmatpush3.bf16.msra.mxu1 %v1394_v24  ;;  %v553_v29 = vld [vmem:[%s1751_s20] sm:$0xff]  ;;  %v554_v31 = vld [vmem:[%s1751_s20 + $0x8] sm:$0xff]  ;;  %v1397_v32 = vld [vmem:[%s1756_s24 + $0x50] sm:$0xff]  }
  0x72   : > { %596 = vperm.xlu0 %1383, %v558_v17   ;;  %1297 = vmatprep.subr.bf16.mxu1 %v1395_v25  ;;  %v565_v33 = vld [vmem:[%s1751_s20 + $0x60] sm:$0xff]  ;;  %v1398_v34 = vld [vmem:[%s1756_s24 + $0x10] sm:$0xff]   ;;  %v1399_v35 = vld [vmem:[%s1756_s24 + $0x58] sm:$0xff]  }
  0x73   : > { %606 = vperm.xlu1 %1384, %v560_v18   ;;  %v1386_v36 = vld [vmem:[%s1733_s18 + $0x8] sm:$0xff]   ;;  %v1387_v38 = vld [vmem:[%s1733_s18 + $0x10] sm:$0xff]   ;;  %v1400_v39 = vld [vmem:[%s1756_s24 + $0x18] sm:$0xff]  }
  0x74   : > { %1269 = vmatpush3.bf16.msra.mxu0 %v386_v11  ;;  %v566_v37 = vld [vmem:[%s1751_s20 + $0x68] sm:$0xff]  ;;  %v1401_v40 = vld [vmem:[%s1756_s24 + $0x60] sm:$0xff]   ;;  %v555_v41 = vld [vmem:[%s1751_s20 + $0x10] sm:$0xff] }
  0x75   : > { %1270 = vmatprep.subr.bf16.mxu0 %v1769_v13  ;;  %1305 = vmatpush3.bf16.msra.mxu1 %v1396_v30  ;;  %v556_v42 = vld [vmem:[%s1751_s20 + $0x18] sm:$0xff]  ;;  %v1402_v43 = vld [vmem:[%s1756_s24 + $0x20] sm:$0xff]   ;;  %v1403_v44 = vld [vmem:[%s1756_s24 + $0x68] sm:$0xff]  }
  0x76   : > { %611 = vperm.xlu0 %1383, %v561_v20   ;;  %1298 = vmatprep.subr.bf16.mxu1 %v1397_v32  ;;  %v567_v45 = vld [vmem:[%s1751_s20 + $0x70] sm:$0xff]  ;;  %v1388_v46 = vld [vmem:[%s1733_s18 + $0x18] sm:$0xff]   ;;  %v1389_v48 = vld [vmem:[%s1733_s18 + $0x20] sm:$0xff]  }
  0x77   : > { %616 = vperm.xlu1 %1384, %v562_v22   ;;  %v568_v47 = vld [vmem:[%s1751_s20 + $0x78] sm:$0xff]  ;;  %v1404_v49 = vld [vmem:[%s1756_s24 + $0x28] sm:$0xff]   ;;  %v1391_v51 = vld [vmem:[%s1733_s18 + $0x30] sm:$0xff]  }
  0x78   : > { %1271 = vmatpush3.bf16.msra.mxu0 %v1769_v13  ;;  %v1390_v50 = vld [vmem:[%s1733_s18 + $0x28] sm:$0xff]   ;;  %v1392_v52 = vld [vmem:[%s1733_s18 + $0x38] sm:$0xff]   ;;  %v1405_v53 = vld [vmem:[%s1756_s24 + $0x70] sm:$0xff]  }
  0x79   : > { %1272 = vmatprep.subr.bf16.mxu0 %v1774_v16  ;;  %1306 = vmatpush3.bf16.msra.mxu1 %v1398_v34  ;;  %v1406_v54 = vld [vmem:[%s1756_s24 + $0x30] sm:$0xff]   ;;  %v1407_v55 = vld [vmem:[%s1756_s24 + $0x78] sm:$0xff]  }
  0x7a   : > { %621 = vperm.xlu0 %1383, %v563_v26   ;;  %1299 = vmatprep.subr.bf16.mxu1 %v1399_v35  ;;  %v1408_v56 = vld [vmem:[%s1756_s24 + $0x38] sm:$0xff]  }
  0x7b   : > { %626 = vperm.xlu1 %1384, %v564_v27  }
  0x7c   : > { %1273 = vmatpush3.bf16.msra.mxu0 %v1774_v16 }
  0x7d   : > { %1274 = vmatprep.subr.bf16.mxu0 %v1780_v19  ;;  %1307 = vmatpush3.bf16.msra.mxu1 %v1400_v39 }
  0x7e   : > { %571 = vperm.xlu0 %1383, %v553_v29   ;;  %1300 = vmatprep.subr.bf16.mxu1 %v1401_v40 }
  0x7f   : > { %576 = vperm.xlu1 %1384, %v554_v31  }
  0x80   : > { %1275 = vmatpush3.bf16.msra.mxu0 %v1780_v19 }
  0x81   : > { %1276 = vmatprep.subr.bf16.mxu0 %v1786_v23  ;;  %1308 = vmatpush3.bf16.msra.mxu1 %v1402_v43 }
  0x82   : > { %631 = vperm.xlu0 %1383, %v565_v33   ;;  %1301 = vmatprep.subr.bf16.mxu1 %v1403_v44 }
  0x83   : > { %636 = vperm.xlu1 %1384, %v566_v37  }
  0x84   : > { %1277 = vmatpush3.bf16.msra.mxu0 %v1786_v23 }
  0x85   : > { %1278 = vmatprep.subr.bf16.mxu0 %v1794_v28  ;;  %1309 = vmatpush3.bf16.msra.mxu1 %v1404_v49 }
  0x86   : > { %581 = vperm.xlu0 %1383, %v555_v41   ;;  %1302 = vmatprep.subr.bf16.mxu1 %v1405_v53 }
  0x87   : > { %586 = vperm.xlu1 %1384, %v556_v42  }
  0x88   : > { %1279 = vmatpush3.bf16.msra.mxu0 %v1794_v28 }
  0x89   : > { %1200 = vmatprep.subr.bf16.mxu0 %v1393_v21  ;;  %1310 = vmatpush3.bf16.msra.mxu1 %v1406_v54 }
  0x8a   : > { %641 = vperm.xlu0 %1383, %v567_v45   ;;  %1303 = vmatprep.subr.bf16.mxu1 %v1407_v55 }
  0x8b   : > { %1281 = vmatmul.mubr.bf16.vlgmr.msra.gmra.mrb[0].mxu0 %v1386_v36  ;;  %646 = vperm.xlu1 %1384, %v568_v47  }
  0x8c   : > { %1284 = vmatprep.mubr.bf16.mxu0 %v1387_v38  ;;  %1201 = vmatpush3.bf16.msra.mxu0 %v1394_v24 }
  0x8d   : > { %1202 = vmatprep.subr.bf16.mxu0 %v1395_v25  ;;  %1311 = vmatpush3.bf16.msra.mxu1 %v1408_v56 }
  0x90   : > { %1203 = vmatpush3.bf16.msra.mxu0 %v1396_v30 }
  0x91   : > { %1204 = vmatprep.subr.bf16.mxu0 %v1397_v32 }
  0x93   : > { %1285 = vmatmul.mubr.bf16.gmra.mrb[4].mxu0 %v1388_v46 }
  0x94   : > { %1288 = vmatprep.mubr.bf16.mxu0 %v1389_v48  ;;  %1205 = vmatpush3.bf16.msra.mxu0 %v1398_v34 }
  0x95   : > { %1206 = vmatprep.subr.bf16.mxu0 %v1399_v35 }
  0x98   : > { %1207 = vmatpush3.bf16.msra.mxu0 %v1400_v39 }
  0x99   : > { %1208 = vmatprep.subr.bf16.mxu0 %v1401_v40 }
  0x9b   : > { %1289 = vmatmul.mubr.bf16.gmra.mrb[8].mxu0 %v1390_v50 }
  0x9c   : > { %1292 = vmatprep.mubr.bf16.mxu0 %v1391_v51  ;;  %1209 = vmatpush3.bf16.msra.mxu0 %v1402_v43 }
  0x9d   : > { %1210 = vmatprep.subr.bf16.mxu0 %v1403_v44 }
  0xa0   : > { %1211 = vmatpush3.bf16.msra.mxu0 %v1404_v49 }
  0xa1   : > { %1212 = vmatprep.subr.bf16.mxu0 %v1405_v53  ;;  %v1840_v53 = vld [vmem:[%s306_s13] ss:$0 sm:$0xff] }
  0xa3   : > { %1293 = vmatmul.mubr.bf16.gmra.mrb[12].mxu0 %v1392_v52 }
  0xa4   : > { %840 = vmatprep.mubr.bf16.mxu0 %v1760_v8  ;;  %1213 = vmatpush3.bf16.msra.mxu0 %v1406_v54 }
  0xa5   : > { %1214 = vmatprep.subr.bf16.mxu0 %v1407_v55 }
  0xa8   : > { %1215 = vmatpush3.bf16.msra.mxu0 %v1408_v56 }
  0xed   : > { %v592_v57 = vpop.permute.xlu0 %591 }
  0xee   : > { %v602_v58 = vpop.permute.xlu1 %601 }
  0xf1   : > { %v597_v59 = vpop.permute.xlu0 %596 }
  0xf2   : > { %v607_v60 = vpop.permute.xlu1 %606 }
  0xf5   : > { %v612_v61 = vpop.permute.xlu0 %611 }
  0xf6   : > { %v617_v62 = vpop.permute.xlu1 %616 }
  0xf9   : > { %v622_v63 = vpop.permute.xlu0 %621 }
  0xfa   : > { %v627_v0 = vpop.permute.xlu1 %626 }
  0xfd   : > { %v572_v1 = vpop.permute.xlu0 %571 }
  0xfe   : > { %v577_v2 = vpop.permute.xlu1 %576 }
 0x101   : > { %v632_v3 = vpop.permute.xlu0 %631 }
 0x102   : > { %v637_v4 = vpop.permute.xlu1 %636 }
 0x105   : > { %v582_v5 = vpop.permute.xlu0 %581 }
 0x106   : > { %v587_v7 = vpop.permute.xlu1 %586 }
 0x109   : > { %v642_v43 = vpop.permute.xlu0 %641 }
 0x10a   : > { %v647_v45 = vpop.permute.xlu1 %646 }
 0x15e   : > { %v1282_v6 = vpop.f32.mrb[0].mxu0 }
 0x15f   : > { %v490_v8 = vpop.f32.mrb[1].mxu0  ;;  %v651_v11 = vmul.f32 %v1282_v6, %v582_v5 }
 0x160   : > { %v1283_v10 = vpop.f32.mrb[2].mxu0  ;;  %v649_v15 = vmul.f32 %v572_v1, %v490_v8 }
 0x161   : > { %v652_v12 = vmul.f32 %v1283_v10, %v587_v7  ;;  %v493_v14 = vpop.f32.mrb[3].mxu0 }
 0x162   : > { %v650_v17 = vmul.f32 %v577_v2, %v493_v14 }
 0x163   : > { %v666_v18 = vpack.c.bf16 %v652_v12, %v651_v11 }
 0x164   : > { %v665_v20 = vpack.c.bf16 %v650_v17, %v649_v15 }
 0x166   : > { %v1286_v21 = vpop.f32.mrb[4].mxu0  ;;  %841 = vmatmul.mubr.bf16.vlgmr.msra.gmra.mrb[16].mxu0 %v665_v20 }
 0x167   : > { %v506_v22 = vpop.f32.mrb[5].mxu0  ;;  %848 = vmatprep.mubr.bf16.mxu0 %v1762_v9  ;;  %v655_v25 = vmul.f32 %v1286_v21, %v602_v58 }
 0x168   : > { %v1287_v24 = vpop.f32.mrb[6].mxu0  ;;  %v653_v29 = vmul.f32 %v592_v57, %v506_v22 }
 0x169   : > { %v656_v26 = vmul.f32 %v1287_v24, %v607_v60  ;;  %v509_v27 = vpop.f32.mrb[7].mxu0 }
 0x16a   : > { %v654_v30 = vmul.f32 %v597_v59, %v509_v27 }
 0x16b   : > { %v668_v31 = vpack.c.bf16 %v656_v26, %v655_v25 }
 0x16c   : > { %v667_v32 = vpack.c.bf16 %v654_v30, %v653_v29 }
 0x16e   : > { %v1290_v33 = vpop.f32.mrb[8].mxu0  ;;  %849 = vmatmul.mubr.bf16.gmra.mrb[20].mxu0 %v666_v18  ;;  %857 = vmatmul.mubr.bf16.vlgmr.msra.gmra.mrb[0].mxu1 %v667_v32 }
 0x16f   : > { %v522_v34 = vpop.f32.mrb[9].mxu0  ;;  %864 = vmatprep.mubr.bf16.mxu1 %v1769_v13  ;;  %v659_v36 = vmul.f32 %v1290_v33, %v622_v63 }
 0x170   : > { %v1291_v35 = vpop.f32.mrb[10].mxu0  ;;  %v657_v39 = vmul.f32 %v612_v61, %v522_v34 }
 0x171   : > { %v660_v37 = vmul.f32 %v1291_v35, %v627_v0  ;;  %v525_v38 = vpop.f32.mrb[11].mxu0 }
 0x172   : > { %v658_v9 = vmul.f32 %v617_v62, %v525_v38 }
 0x173   : > { %v670_v40 = vpack.c.bf16 %v660_v37, %v659_v36 }
 0x174   : > { %v669_v41 = vpack.c.bf16 %v658_v9, %v657_v39 }
 0x176   : > { %v1294_v42 = vpop.f32.mrb[12].mxu0  ;;  %865 = vmatmul.mubr.bf16.gmra.mrb[4].mxu1 %v668_v31 }
 0x177   : > { %v538_v44 = vpop.f32.mrb[13].mxu0  ;;  %872 = vmatprep.mubr.bf16.mxu1 %v1774_v16  ;;  %v663_v47 = vmul.f32 %v1294_v42, %v642_v43 }
 0x178   : > { %v1295_v46 = vpop.f32.mrb[14].mxu0  ;;  %v661_v49 = vmul.f32 %v632_v3, %v538_v44 }
 0x179   : > { %v664_v48 = vmul.f32 %v1295_v46, %v647_v45  ;;  %v541_v13 = vpop.f32.mrb[15].mxu0 }
 0x17a   : > { %v662_v50 = vmul.f32 %v637_v4, %v541_v13 }
 0x17b   : > { %v672_v51 = vpack.c.bf16 %v664_v48, %v663_v47 }
 0x17c   : > { %v671_v52 = vpack.c.bf16 %v662_v50, %v661_v49 }
 0x17e   : > { %873 = vmatmul.mubr.bf16.gmra.mrb[8].mxu1 %v669_v41 }
 0x17f   : > { %880 = vmatprep.mubr.bf16.mxu1 %v1780_v19 }
 0x186   : > { %881 = vmatmul.mubr.bf16.gmra.mrb[12].mxu1 %v670_v40 }
 0x187   : > { %888 = vmatprep.mubr.bf16.mxu1 %v1786_v23 }
 0x18e   : > { %889 = vmatmul.mubr.bf16.gmra.mrb[16].mxu1 %v671_v52 }
 0x18f   : > { %896 = vmatprep.mubr.bf16.mxu1 %v1794_v28 }
 0x196   : > { %897 = vmatmul.mubr.bf16.gmra.mrb[20].mxu1 %v672_v51 }
 0x239   : > { %v1216_v16 = vpop.f32.mrb[16].mxu0 }
 0x23a   : > { %v1217_v54 = vpop.f32.mrb[17].mxu0 }
 0x23b   : > { %v1218_v55 = vadd.f32 %v1217_v54, %v1216_v16  ;;  %v1219_v56 = vpop.f32.mrb[18].mxu0  ;;  %v909_v54 = vlaneseq (!%p1175_p9) }
 0x23c   : > { %v1220_v57 = vpop.f32.mrb[19].mxu0 }
 0x23d   : > { %v1843_v19 = vadd.f32 %v1218_v55, %v1840_v53  ;;  %v1221_v58 = vadd.f32 %v1220_v57, %v1219_v56 }
 0x23f   : > { %v1846_v23 = vadd.f32 %v1221_v58, %v1840_v53  ;;  %v944_v55 = vmax.f32 (!%p1175_p9), %v1843_v19, 0.0 }
 0x241   : > { %v1222_v28 = vpop.f32.mrb[20].mxu0  ;;  %v1228_v59 = vpop.f32.mrb[0].mxu1  ;;  %v945_v56 = vmax.f32 (!%p1175_p9), %v1846_v23, 0.0 }
 0x242   : > { %v1223_v60 = vpop.f32.mrb[21].mxu0  ;;  %v1229_v61 = vpop.f32.mrb[1].mxu1 }
 0x243   : > { %v1224_v62 = vadd.f32 %v1223_v60, %v1222_v28  ;;  %v1230_v63 = vadd.f32 %v1229_v61, %v1228_v59  ;;  %v1225_v0 = vpop.f32.mrb[22].mxu0  ;;  %v1231_v1 = vpop.f32.mrb[2].mxu1  ;;  %v910_v60 = vshrl.u32 (!%p1175_p9), %v909_v54, 7 }
 0x244   : > { %v1226_v2 = vpop.f32.mrb[23].mxu0  ;;  %v1232_v3 = vpop.f32.mrb[3].mxu1 }
 0x245   : > { %v1849_v4 = vadd.f32 %v1224_v62, %v1840_v53  ;;  %v1852_v5 = vadd.f32 %v1230_v63, %v1840_v53  ;;  %v1227_v6 = vadd.f32 %v1226_v2, %v1225_v0  ;;  %v1233_v7 = vadd.f32 %v1232_v3, %v1231_v1 }
 0x247   : > { %v1855_v8 = vadd.f32 %v1227_v6, %v1840_v53  ;;  %v1858_v10 = vadd.f32 %v1233_v7, %v1840_v53  ;;  %v946_v57 = vmax.f32 (!%p1175_p9), %v1849_v4, 0.0  ;;  %v948_v28 = vmax.f32 (!%p1175_p9), %v1852_v5, 0.0 }
 0x248   : > { %v911_v4 = vadd.s32 (!%p1175_p9), 8, %v910_v60  ;;  %v912_v5 = vadd.s32 (!%p1175_p9), 16, %v910_v60  ;;  %v913_v6 = vadd.s32 (!%p1175_p9), 24, %v910_v60  ;;  %v914_v7 = vadd.s32 (!%p1175_p9), 32, %v910_v60 }
 0x249   : > { %v1234_v11 = vpop.f32.mrb[4].mxu1  ;;  %v947_v58 = vmax.f32 (!%p1175_p9), %v1855_v8, 0.0  ;;  %v915_v8 = vadd.s32 (!%p1175_p9), 40, %v910_v60 }
 0x24a   : > { %v1235_v12 = vpop.f32.mrb[5].mxu1 }
 0x24b   : > { %v1236_v14 = vadd.f32 %v1235_v12, %v1234_v11  ;;  %v1237_v15 = vpop.f32.mrb[6].mxu1  ;;  %v917_v11 = vadd.s32 (!%p1175_p9), 56, %v910_v60  ;;  %v918_v12 = vadd.s32 (!%p1175_p9), 64, %v910_v60 }
 0x24c   : > { %v1238_v17 = vpop.f32.mrb[7].mxu1 }
 0x24d   : > { %v1861_v18 = vadd.f32 %v1236_v14, %v1840_v53  ;;  %v1239_v20 = vadd.f32 %v1238_v17, %v1237_v15  ;;  %v927_v14 = vstv (!%p1175_p9), %s926_s14  ;;  %v919_v15 = vadd.s32 (!%p1175_p9), 72, %v910_v60 }
 0x24e   : > { %v920_v17 = vadd.s32 (!%p1175_p9), 80, %v910_v60  ;;  %vm928_vm0 = vcmp.lt.s32.totalorder (!%p1175_p9), %v910_v60, %v927_v14  ;;  %vm929_vm1 = vcmp.lt.s32.totalorder (!%p1175_p9), %v911_v4, %v927_v14  ;;  %vm930_vm2 = vcmp.lt.s32.totalorder (!%p1175_p9), %v912_v5, %v927_v14 }
 0x24f   : > { %v1864_v21 = vadd.f32 %v1239_v20, %v1840_v53  ;;  %v950_v59 = vmax.f32 (!%p1175_p9), %v1861_v18, 0.0  ;;  %v921_v18 = vadd.s32 (!%p1175_p9), 88, %v910_v60  ;;  %vm931_vm3 = vcmp.lt.s32.totalorder (!%p1175_p9), %v913_v6, %v927_v14 }
 0x250   : > { %v960_v20 = vsel (!%p1175_p9), %vm928_vm0, %v944_v55, 0.0  ;;  %vm932_vm4 = vcmp.lt.s32.totalorder (!%p1175_p9), %v914_v7, %v927_v14  ;;  %vm933_vm5 = vcmp.lt.s32.totalorder (!%p1175_p9), %v915_v8, %v927_v14  ;;  %vm935_vm7 = vcmp.lt.s32.totalorder (!%p1175_p9), %v917_v11, %v927_v14 }
 0x251   : > { %v1240_v22 = vpop.f32.mrb[8].mxu1  ;;  %v951_v61 = vmax.f32 (!%p1175_p9), %v1864_v21, 0.0  ;;  %v961_v21 = vsel (!%p1175_p9), %vm929_vm1, %v945_v56, 0.0  ;;  %vm936_vm8 = vcmp.lt.s32.totalorder (!%p1175_p9), %v918_v12, %v927_v14  ;;  %vm937_vm9 = vcmp.lt.s32.totalorder (!%p1175_p9), %v919_v15, %v927_v14 }
 0x252   : > { %v1241_v24 = vpop.f32.mrb[9].mxu1  ;;  %vm938_vm10 = vcmp.lt.s32.totalorder (!%p1175_p9), %v920_v17, %v927_v14  ;;  %vm939_vm11 = vcmp.lt.s32.totalorder (!%p1175_p9), %v921_v18, %v927_v14 }
 0x253   : > { %v1242_v25 = vadd.f32 %v1241_v24, %v1240_v22  ;;  %v1243_v26 = vpop.f32.mrb[10].mxu1  ;;  %v962_v22 = vsel (!%p1175_p9), %vm930_vm2, %v946_v57, 0.0  ;;  %v963_v24 = vsel (!%p1175_p9), %vm931_vm3, %v947_v58, 0.0 }
 0x254   : > { %v1244_v27 = vpop.f32.mrb[11].mxu1 }
 0x255   : > { %v1867_v29 = vadd.f32 %v1242_v25, %v1840_v53  ;;  %v1245_v30 = vadd.f32 %v1244_v27, %v1243_v26  ;;  %v976_v25 = vpack.c.bf16 (!%p1175_p9), %v961_v21, %v960_v20  ;;  %v977_v26 = vpack.c.bf16 (!%p1175_p9), %v963_v24, %v962_v22 }
 0x256   : > { %v964_v27 = vsel (!%p1175_p9), %vm932_vm4, %v948_v28, 0.0 }
 0x257   : > { %v1870_v31 = vadd.f32 %v1245_v30, %v1840_v53  ;;  %v952_v62 = vmax.f32 (!%p1175_p9), %v1867_v29, 0.0  ;;  %984 = vst [vmem:[#allocation2] sm:$0xff] (!%p1175_p9), %v976_v25  ;;  %985 = vst [vmem:[#allocation2 + $0x8] sm:$0xff] (!%p1175_p9), %v977_v26 }
 0x259   : > { %v1246_v32 = vpop.f32.mrb[12].mxu1  ;;  %v953_v63 = vmax.f32 (!%p1175_p9), %v1870_v31, 0.0 }
 0x25a   : > { %v1247_v33 = vpop.f32.mrb[13].mxu1 }
 0x25b   : > { %v1248_v34 = vadd.f32 %v1247_v33, %v1246_v32  ;;  %v1249_v35 = vpop.f32.mrb[14].mxu1  ;;  %v967_v32 = vsel (!%p1175_p9), %vm935_vm7, %v951_v61, 0.0 }
 0x25c   : > { %v1250_v36 = vpop.f32.mrb[15].mxu1 }
 0x25d   : > { %v1873_v37 = vadd.f32 %v1248_v34, %v1840_v53  ;;  %v1251_v38 = vadd.f32 %v1250_v36, %v1249_v35  ;;  %v968_v34 = vsel (!%p1175_p9), %vm936_vm8, %v952_v62, 0.0  ;;  %v969_v35 = vsel (!%p1175_p9), %vm937_vm9, %v953_v63, 0.0 }
 0x25f   : > { %v1876_v39 = vadd.f32 %v1251_v38, %v1840_v53  ;;  %v954_v0 = vmax.f32 (!%p1175_p9), %v1873_v37, 0.0  ;;  %v922_v37 = vadd.s32 (!%p1175_p9), 96, %v910_v60  ;;  %v980_v38 = vpack.c.bf16 (!%p1175_p9), %v969_v35, %v968_v34 }
 0x261   : > { %v1252_v9 = vpop.f32.mrb[16].mxu1  ;;  %v955_v1 = vmax.f32 (!%p1175_p9), %v1876_v39, 0.0  ;;  %v970_v36 = vsel (!%p1175_p9), %vm938_vm10, %v954_v0, 0.0  ;;  %vm940_vm12 = vcmp.lt.s32.totalorder (!%p1175_p9), %v922_v37, %v927_v14  ;;  %988 = vst [vmem:[#allocation2 + $0x20] sm:$0xff] (!%p1175_p9), %v980_v38 }
 0x262   : > { %v1253_v40 = vpop.f32.mrb[17].mxu1 }
 0x263   : > { %v1254_v41 = vadd.f32 %v1253_v40, %v1252_v9  ;;  %v1255_v42 = vpop.f32.mrb[18].mxu1  ;;  %v971_v39 = vsel (!%p1175_p9), %vm939_vm11, %v955_v1, 0.0  ;;  %v923_v9 = vadd.s32 (!%p1175_p9), 104, %v910_v60  ;;  %v924_v40 = vadd.s32 (!%p1175_p9), 112, %v910_v60 }
 0x264   : > { %v1256_v43 = vpop.f32.mrb[19].mxu1 }
 0x265   : > { %v1879_v44 = vadd.f32 %v1254_v41, %v1840_v53  ;;  %v1257_v45 = vadd.f32 %v1256_v43, %v1255_v42  ;;  %v981_v41 = vpack.c.bf16 (!%p1175_p9), %v971_v39, %v970_v36  ;;  %v925_v42 = vadd.s32 (!%p1175_p9), 120, %v910_v60 }
 0x266   : > { %vm941_vm13 = vcmp.lt.s32.totalorder (!%p1175_p9), %v923_v9, %v927_v14  ;;  %vm942_vm14 = vcmp.lt.s32.totalorder (!%p1175_p9), %v924_v40, %v927_v14 }
 0x267   : > { %v1882_v46 = vadd.f32 %v1257_v45, %v1840_v53  ;;  %v956_v2 = vmax.f32 (!%p1175_p9), %v1879_v44, 0.0  ;;  %989 = vst [vmem:[#allocation2 + $0x28] sm:$0xff] (!%p1175_p9), %v981_v41  ;;  %vm943_vm15 = vcmp.lt.s32.totalorder (!%p1175_p9), %v925_v42, %v927_v14 }
 0x269   : > { %v1258_v47 = vpop.f32.mrb[20].mxu1  ;;  %908 = sbr.rel (%p1175_p9) target bundleno = 631 (0x277), region = 56  ;;  %v957_v3 = vmax.f32 (!%p1175_p9), %v1882_v46, 0.0  ;;  %v972_v44 = vsel (!%p1175_p9), %vm940_vm12, %v956_v2, 0.0 }
 0x26a   : > { %v1259_v48 = vpop.f32.mrb[21].mxu1 }
 0x26b   : > { %v1260_v13 = vadd.f32 %v1259_v48, %v1258_v47  ;;  %v1261_v49 = vpop.f32.mrb[22].mxu1  ;;  %v973_v46 = vsel (!%p1175_p9), %vm941_vm13, %v957_v3, 0.0 }
 0x26c   : > { %v1262_v50 = vpop.f32.mrb[23].mxu1  ;;  %v982_v48 = vpack.c.bf16 (!%p1175_p9), %v973_v46, %v972_v44 }
 0x26d   : > { %v1885_v51 = vadd.f32 %v1260_v13, %v1840_v53  ;;  %v1263_v52 = vadd.f32 %v1262_v50, %v1261_v49 }
 0x26e   : > { %990 = vst [vmem:[#allocation2 + $0x30] sm:$0xff] (!%p1175_p9), %v982_v48 }
 0x26f   : > { %v1888_v16 = vadd.f32 %v1263_v52, %v1840_v53  ;;  %v949_v53 = vmax.f32 (!%p1175_p9), %v1858_v10, 0.0  ;;  %v916_v10 = vadd.s32 (!%p1175_p9), 48, %v910_v60  ;;  %v958_v43 = vmax.f32 (!%p1175_p9), %v1885_v51, 0.0 }
 0x271   : > { %v965_v29 = vsel %vm933_vm5, %v949_v53, 0.0  ;;  %vm934_vm6 = vcmp.lt.s32.totalorder %v916_v10, %v927_v14  ;;  %v959_v45 = vmax.f32 %v1888_v16, 0.0  ;;  %v974_v47 = vsel %vm942_vm14, %v958_v43, 0.0 }
 0x272   : > { %v978_v30 = vpack.c.bf16 %v965_v29, %v964_v27  ;;  %v966_v31 = vsel %vm934_vm6, %v950_v59, 0.0 }
 0x273   : > { %v979_v33 = vpack.c.bf16 %v967_v32, %v966_v31  ;;  %v975_v13 = vsel %vm943_vm15, %v959_v45, 0.0 }
 0x274   : > { %986 = vst [vmem:[#allocation2 + $0x10] sm:$0xff] %v978_v30  ;;  %v983_v49 = vpack.c.bf16 %v975_v13, %v974_v47 }
 0x275   : > { %987 = vst [vmem:[#allocation2 + $0x18] sm:$0xff] %v979_v33 }
 0x276   : > { %991 = vst [vmem:[#allocation2 + $0x38] sm:$0xff] %v983_v49 }
 0x277 PF: > { %p1176_p10 = scmp.ne.s32.totalorder %s1625_s29, 1 }
 0x278   : > { %v996_v50 = vlaneseq (!%p1176_p10) }
 0x279   : > { %995 = sbr.rel (%p1176_p10) target bundleno = 957 (0x3bd), region = 60 }
 0x27a   : > { %v997_v51 = vand.u32 (!%p1176_p10), 127, %v996_v50 }
 0x27c   : > { %vm998_vm0 = vcmp.lt.s32.totalorder (!%p1176_p10), %v997_v51, 16 }
 0x27d   : > { %v999_v52 = vsel (!%p1176_p10), %vm998_vm0, %v1843_v19, -1e+30  ;;  %v1000_v16 = vsel (!%p1176_p10), %vm998_vm0, %v1846_v23, -1e+30 }
 0x27e   : > { %1001 = vmax.xlane.f32.xlu0 (!%p1176_p10), %v999_v52 }
 0x282   : > { %1003 = vmax.xlane.f32.xlu0 %v1000_v16 }
 0x30b   : > { %v1002_v54 = vpop.xlane.xlu0 %1001 }
 0x30c   : > { %v1005_v55 = vsub.f32 %v999_v52, %v1002_v54 }
 0x30e   : > { %v1007_v56 = vmul.f32 1.442695, %v1005_v55 }
 0x30f   : > { %v1004_v57 = vpop.xlane.xlu0 %1003 }
 0x310   : > { %v1006_v58 = vsub.f32 %v1000_v16, %v1004_v57  ;;  %1409 = vpow2.f32 %v1007_v56 }
 0x312   : > { %v1009_v28 = vmul.f32 1.442695, %v1006_v58 }
 0x314   : > { %1411 = vpow2.f32 %v1009_v28 }
 0x31a   : > { %v1410_v53 = vpop.eup %1409 }
 0x31b   : > { %1011 = vadd.xlane.f32.xlu1 %v1410_v53 }
 0x31e   : > { %v1412_v59 = vpop.eup %1411 }
 0x31f   : > { %1013 = vadd.xlane.f32.xlu1 %v1412_v59 }
 0x3a8   : > { %v1012_v60 = vpop.xlane.xlu1 %1011 }
 0x3a9   : > { %1413 = vlog2.f32 %v1012_v60 }
 0x3ac   : > { %v1014_v61 = vpop.xlane.xlu1 %1013 }
 0x3ad   : > { %1415 = vlog2.f32 %v1014_v61 }
 0x3b3   : > { %v1414_v19 = vpop.eup %1413 }
 0x3b4   : > { %v1016_v62 = vmul.f32 0.6931472, %v1414_v19 }
 0x3b6   : > { %v1019_v23 = vsub.f32 %v1005_v55, %v1016_v62 }
 0x3b7   : > { %v1416_v63 = vpop.eup %1415 }
 0x3b8   : > { %1021 = vst [vmem:[#allocation10] sm:$0xff] %v1019_v23  ;;  %v1018_v0 = vmul.f32 0.6931472, %v1416_v63 }
 0x3ba   : > { %v1020_v1 = vsub.f32 %v1006_v58, %v1018_v0 }
 0x3bc   : > { %1022 = vst [vmem:[#allocation10 + $0x8] sm:$0xff] %v1020_v1 }
 0x3bd PF: > { %s1565_s15 = smov [#allocation10]  }
 0x3be   : > { %s1029_s16 = sshll.u32 %s1565_s15, 4  ;;  %s1030_s16 = int_to_ptr.vmem [resolvable:$true] %s1029_s16 }
 0x3bf   : > { %s1487_s17 = scalar_lea.vmem %s1030_s16, 256  ;;  %p1494_p3 = scmp.lt.s32.totalorder %s1030_s16, %s1030_s16 }
 0x3c0   : > { %p1488_p11 = scmp.ne.s32.totalorder %s1030_s16, %s1487_s17  ;;  %p1495_p5 = scmp.lt.s32.totalorder %s1487_s17, %s1487_s17 }
 0x3c2   : > { %p1489_p0 = pnand %p1488_p11, %p1175_p9  ;;  %p1496_p7 = por %p1495_p5, %p1494_p3 }
 0x3c4   : > { %p1490_p1 = pneg %p1489_p0 }
 0x3c6   : > { %p1497_p2 = pnand %p1496_p7, %p1490_p1 }
 0x3c8   : > { %1500 = shalt.err (!%p1497_p2)
}
 0x3c9   : > { %s1501_s18 = scalar_lea.hbm %s1954_s6, 256 }
 0x3ca   : > { %p1502_p4 = scmp.ne.s32.totalorder %s1954_s6, %s1501_s18  ;;  %p1507_p13 = scmp.lt.u32.totalorder %s1501_s18, %s1954_s6 }
 0x3cc   : > { %p1503_p8 = pnand %p1502_p4, %p1175_p9 }
 0x3ce   : > { %p1504_p12 = pneg %p1503_p8 }
 0x3d0   : > { %p1509_p6 = pnand %p1507_p13, %p1504_p12 }
 0x3d2   : > { %1512 = shalt.err (!%p1509_p6)
}
 0x3d3   : > { %s1566_s13 = smov 128   ;;  %s1567_s28 = smov 8  }
 0x3d4   : > { %1319 = dma.vmem_to_hbm [thread:$0]  (%p1175_p9), %s1030_s16, 256, %s1954_s6, [#allocation7], %s1566_s13, %s1566_s13, %s1567_s28  }
 0x3d5   : > { %1540 = dma.done.wait (%p1175_p9), [#allocation7], 256  }
 0x3d6   : > { %1542 = vsyncadd (%p1175_p9), [#allocation7], 4294967040 }
 0x3d7 PF: > { %s1967_s21 = smov %s1680_s26  ;;  %p24_p10 = scmp.ge.s32.totalorder %s1651_s11, 4  }
 0x3d8   : > { %s1968_s26 = smov %s1549_s0  ;;  %s1969_s0 = smov %s1553_s27 }
 0x3d9   : > { %s1970_s27 = smov %s1967_s21  ;;  %s1971_s28 = smov %s1651_s11 }
 0x3da   :  { %26 = sbr.rel (!%p24_p10) target bundleno = 20 (0x14), region = 103 }
 0x3e1   :  { %1045 = vsyncpa [#allocation6], 1 }
 0x3e2   :  { %1047 = vsyncpa [#allocation6 + $0x1], 1 }
 0x3e3   :  { %1048 = vsyncpa [#allocation9], 1 }
 0x3e4   :  { %1050 = vsyncpa [#allocation9 + $0x1], 1 }
 0x3e5   :  { %1051 = vsyncpa [#allocation7], 1 }
 0x3e6   :  { %1053 = vsyncpa [#allocation7 + $0x1], 1 }

</bundles_post_ra>
